<compile_context>
chip_gen: v7x
topology: tpu7x:2x2x1
jax: 0.10.0
libtpu: 0.0.40
codegen_flags: <defaults>
</compile_context>

<pallas_src>
import jax
import jax.numpy as jnp
from jax.experimental import pallas as pl
from jax.experimental.pallas import tpu as pltpu


_LANE = 128
_SUBLANE = 8
_BLOCK_BUDGET = 16 * 1024 * 1024      # double-buffered block budget (safe on v5e/v6e/v7x)
_VMEM_LIMIT = 32 * 1024 * 1024        # explicit scoped-VMEM limit (<= physical on all gens)


def _round_up(x, m):
    return (x + m - 1) // m * m


def _make_shortcut_kernel(bb, c_in, c_out, pad, hw, hwh):
    def kernel(s_ref, x_ref, o_ref):
        # s_ref: (hw, hwh)        one-hot select matrix (exact 0/1 entries)
        # x_ref: (bb, c_in, hw)   lane-dense input block
        # o_ref: (bb, c_out, hwh) lane-dense output block
        x2d = x_ref[...].reshape(bb * c_in, hw)          # free when c_in % 8 == 0
        sub = jnp.dot(
            x2d, s_ref[...],
            preferred_element_type=jnp.float32,
            precision=jax.lax.Precision.HIGHEST,         # fp32 contract: one-hot select is exact
        )
        sub = sub.reshape(bb, c_in, hwh).astype(o_ref.dtype)
        if pad > 0:
            zband = jnp.zeros((bb, pad, hwh), dtype=o_ref.dtype)
            o_ref[:, 0:pad, :] = zband                   # leading zero channels
            o_ref[:, pad + c_in:c_out, :] = zband        # trailing zero channels
        o_ref[:, pad:pad + c_in, :] = sub                # decimated input channels

    return kernel


def _pick_batch_block(n, c_in, c_out, hw, hwh, itemsize):
    # Padded VMEM footprint of one image's in/out blocks (double-buffered) plus
    # the (possibly double-buffered) resident select matrix.
    in_img = _round_up(c_in, _SUBLANE) * _round_up(hw, _LANE) * itemsize
    out_img = _round_up(c_out, _SUBLANE) * _round_up(hwh, _LANE) * itemsize
    per_img = 2 * (in_img + out_img)
    sel_bytes = 2 * _round_up(hw, _SUBLANE) * _round_up(hwh, _LANE) * itemsize
    bb = max(1, (_BLOCK_BUDGET - sel_bytes) // per_img)
    bb = min(bb, n)
    if n >= 4:
        bb = min(bb, n // 4)   # keep >=4 grid steps: megacore split + cross-step DMA overlap
    while n % bb:
        bb -= 1
    return bb


def lambda_shortcut(x_nchw, planes):
    """Pallas TPU implementation of the ResNet(CIFAR) option-A shortcut lambda."""
    n, c_in, h, w = x_nchw.shape
    # TODO(synk): PyTorch's ::2 keeps ceil(H/2) rows/cols for odd H/W; only even (CIFAR) supported.
    assert h % 2 == 0 and w % 2 == 0, "even spatial dims required"
    pad = planes // 4
    c_out = c_in + 2 * pad
    hh, wh = h // 2, w // 2
    hw, hwh = h * w, hh * wh

    # One-hot select: S[y*w + xc, yh*wh + xh] = 1 iff y == 2*yh and xc == 2*xh.
    src = (2 * jnp.arange(hh, dtype=jnp.int32)[:, None] * w
           + 2 * jnp.arange(wh, dtype=jnp.int32)[None, :]).reshape(-1)            # (hwh,)
    sel = (jnp.arange(hw, dtype=jnp.int32)[:, None] == src[None, :]).astype(x_nchw.dtype)

    bb = _pick_batch_block(n, c_in, c_out, hw, hwh, x_nchw.dtype.itemsize)

    x3 = x_nchw.reshape(n, c_in, hw)                      # free reshape (contiguous NCHW)

    out3 = pl.pallas_call(
        _make_shortcut_kernel(bb, c_in, c_out, pad, hw, hwh),
        out_shape=jax.ShapeDtypeStruct((n, c_out, hwh), x_nchw.dtype),
        grid=(n // bb,),
        in_specs=[
            pl.BlockSpec((hw, hwh), lambda i: (0, 0)),          # resident select matrix
            pl.BlockSpec((bb, c_in, hw), lambda i: (i, 0, 0)),  # lane-dense input block
        ],
        out_specs=pl.BlockSpec((bb, c_out, hwh), lambda i: (i, 0, 0)),
        compiler_params=pltpu.CompilerParams(
            dimension_semantics=("parallel",),
            vmem_limit_bytes=_VMEM_LIMIT,
        ),
    )(sel, x3)

    return out3.reshape(n, c_out, hh, wh)                 # free reshape


class LambdaLayer:
    """JAX equivalent of the PyTorch LambdaLayer: applies self.lambd in forward."""

    def __init__(self, lambd):
        self.lambd = lambd

    def __call__(self, x):
        return self.lambd(x)


if __name__ == "__main__":
    key = jax.random.PRNGKey(0)
    N, C, H, W = 2, 16, 16, 16
    planes = 32                        # option-A shortcut 16 -> 32 channels: pad planes//4 = 8
    x = jax.random.normal(key, (N, C, H, W), dtype=jnp.float32)

    layer = LambdaLayer(lambda t: lambda_shortcut(t, planes))
    out = jax.block_until_ready(layer(x))

    # pure-JAX reference of the PyTorch lambda
    pad = planes // 4
    ref = jnp.pad(x[:, :, ::2, ::2],
                  ((0, 0), (pad, pad), (0, 0), (0, 0)),
                  mode="constant", constant_values=0.0)

    assert out.shape == (N, C + 2 * pad, H // 2, W // 2), out.shape
    assert out.dtype == x.dtype
    assert jnp.allclose(out, ref, atol=1e-6, rtol=1e-6), "mismatch vs reference"
    print("KERNEL_OK")
</pallas_src>

<mosaic_0001>
module attributes {stable_mosaic.version = 11 : i64} {
  func.func @kernel(%arg0: i32, %arg1: memref<256x64xf32, #tpu.memory_space<vmem>>, %arg2: memref<2x16x256xf32, #tpu.memory_space<vmem>>, %arg3: memref<2x32x64xf32, #tpu.memory_space<vmem>>) attributes {dimension_semantics = [#tpu.dimension_semantics<parallel>], iteration_bounds = array<i64: 1>, scalar_prefetch = 0 : i64, scratch_operands = 0 : i64, tpu.core_type = #tpu.core_type<tc>, window_params = [{pipeline_mode = #tpu.pipeline_mode<synchronous>, transform_indices = @transform_0, window_bounds = array<i64: 256, 64>}, {transform_indices = @transform_1, window_bounds = array<i64: 2, 16, 256>}, {transform_indices = @transform_2, window_bounds = array<i64: 2, 32, 64>}]} {
    %c0 = arith.constant 0 : index
    %c0_0 = arith.constant 0 : index
    %c0_1 = arith.constant 0 : index
    %0 = vector.load %arg2[%c0, %c0_0, %c0_1] : memref<2x16x256xf32, #tpu.memory_space<vmem>>, vector<2x16x256xf32>
    %1 = vector.shape_cast %0 : vector<2x16x256xf32> to vector<32x256xf32>
    %c0_2 = arith.constant 0 : index
    %c0_3 = arith.constant 0 : index
    %2 = vector.load %arg1[%c0_2, %c0_3] : memref<256x64xf32, #tpu.memory_space<vmem>>, vector<256x64xf32>
    %cst = arith.constant dense<0.000000e+00> : vector<32x64xf32>
    %3 = tpu.matmul %1, %2, %cst {dimension_numbers = #tpu.dot_dimension_numbers<[1], [0], [0], [1], [0, 0, 1, 1], [], []>, precision = #tpu.contract_precision<fp32>} : vector<32x256xf32>, vector<256x64xf32>, vector<32x64xf32> -> vector<32x64xf32>
    %4 = vector.shape_cast %3 : vector<32x64xf32> to vector<2x16x64xf32>
    %cst_4 = arith.constant 0.000000e+00 : f32
    %5 = vector.broadcast %cst_4 : f32 to vector<2x8x64xf32>
    %c0_5 = arith.constant 0 : index
    %c0_6 = arith.constant 0 : index
    %c0_7 = arith.constant 0 : index
    %6 = vector.load %arg3[%c0_5, %c0_6, %c0_7] : memref<2x32x64xf32, #tpu.memory_space<vmem>>, vector<2x8x64xf32>
    tpu.vector_store %arg3[%c0_5, %c0_6, %c0_7], %5 {strides = array<i32>} : memref<2x32x64xf32, #tpu.memory_space<vmem>>, vector<2x8x64xf32>,
    %c0_8 = arith.constant 0 : index
    %c24 = arith.constant 24 : index
    %c0_9 = arith.constant 0 : index
    %7 = vector.load %arg3[%c0_8, %c24, %c0_9] : memref<2x32x64xf32, #tpu.memory_space<vmem>>, vector<2x8x64xf32>
    tpu.vector_store %arg3[%c0_8, %c24, %c0_9], %5 {strides = array<i32>} : memref<2x32x64xf32, #tpu.memory_space<vmem>>, vector<2x8x64xf32>,
    %c0_10 = arith.constant 0 : index
    %c8 = arith.constant 8 : index
    %c0_11 = arith.constant 0 : index
    %8 = vector.load %arg3[%c0_10, %c8, %c0_11] : memref<2x32x64xf32, #tpu.memory_space<vmem>>, vector<2x16x64xf32>
    tpu.vector_store %arg3[%c0_10, %c8, %c0_11], %4 {strides = array<i32>} : memref<2x32x64xf32, #tpu.memory_space<vmem>>, vector<2x16x64xf32>,
    return
  }
  func.func @transform_0(%arg0: i32) -> (i32, i32) {
    %c0_i32 = arith.constant 0 : i32
    %c0_i32_0 = arith.constant 0 : i32
    %c0_i32_1 = arith.constant 0 : i32
    return %c0_i32, %c0_i32_0 : i32, i32
  }
  func.func @transform_1(%arg0: i32) -> (i32, i32, i32) {
    %c0_i32 = arith.constant 0 : i32
    %c0_i32_0 = arith.constant 0 : i32
    %c0_i32_1 = arith.constant 0 : i32
    return %arg0, %c0_i32, %c0_i32_0 : i32, i32, i32
  }
  func.func @transform_2(%arg0: i32) -> (i32, i32, i32) {
    %c0_i32 = arith.constant 0 : i32
    %c0_i32_0 = arith.constant 0 : i32
    %c0_i32_1 = arith.constant 0 : i32
    return %arg0, %c0_i32, %c0_i32_0 : i32, i32, i32
  }
}

</mosaic_0001>

<bundles_post_ra>
// kernel: tpu_custom_call.1
= control target key start
LH: loop header
LB: loop body
LE: loop exit
PB: predicated region body
PF: predicated region fallthrough
CT: control target
= control target key end

     0   :  { %s2250_s0 = inlined_call_operand.vmem [shape: f32[256,64], index: 0, kind: input, shape index: {}]   ;;  %s2251_s1 = inlined_call_operand.vmem [shape: f32[2,16,256], index: 1, kind: input, shape index: {}]   ;;  %s2252_s2 = inlined_call_operand.hbm [shape: f32[2,32,64], index: 2, kind: output, shape index: {}]  }
   0x1   :  { %v36_v0 = vld [vmem:[%s2250_s0 + $0x80] sm:$0xff]  ;;  %v37_v1 = vld [vmem:[%s2250_s0 + $0x88] sm:$0xff]  ;;  %v38_v7 = vld [vmem:[%s2250_s0 + $0x90] sm:$0xff] }
   0x2   :  { %v20_v2 = vld [vmem:[%s2250_s0] sm:$0xff]  ;;  %v101_v3 = vand.u32 4294901760, %v36_v0  ;;  %v104_v4 = vand.u32 4294901760, %v37_v1  ;;  %v21_v5 = vld [vmem:[%s2250_s0 + $0x8] sm:$0xff]  ;;  %v39_v8 = vld [vmem:[%s2250_s0 + $0x98] sm:$0xff]  ;;  %v107_v10 = vand.u32 4294901760, %v38_v7 }
   0x3   :  { %v53_v6 = vand.u32 4294901760, %v20_v2  ;;  %v56_v9 = vand.u32 4294901760, %v21_v5  ;;  %v110_v11 = vand.u32 4294901760, %v39_v8  ;;  %v22_v12 = vld [vmem:[%s2250_s0 + $0x10] sm:$0xff]  ;;  %v23_v13 = vld [vmem:[%s2250_s0 + $0x18] sm:$0xff]  ;;  %v40_v18 = vld [vmem:[%s2250_s0 + $0xa0] sm:$0xff] }
   0x4   :  { %v1634_v14 = vpack.c.bf16 %v104_v4, %v101_v3  ;;  %v59_v16 = vand.u32 4294901760, %v22_v12  ;;  %v62_v17 = vand.u32 4294901760, %v23_v13  ;;  %v41_v19 = vld [vmem:[%s2250_s0 + $0xa8] sm:$0xff]  ;;  %v24_v23 = vld [vmem:[%s2250_s0 + $0x20] sm:$0xff]  ;;  %v1657_v25 = vsub.f32 %v38_v7, %v107_v10  ;;  %v42_v37 = vld [vmem:[%s2250_s0 + $0xb0] sm:$0xff] }
   0x5   :  { %v1636_v15 = vsub.f32 %v20_v2, %v53_v6  ;;  %v1644_v20 = vpack.c.bf16 %v56_v9, %v53_v6  ;;  %v1646_v21 = vsub.f32 %v21_v5, %v56_v9  ;;  %v1648_v22 = vpack.c.bf16 %v110_v11, %v107_v10  ;;  %v25_v24 = vld [vmem:[%s2250_s0 + $0x28] sm:$0xff]  ;;  %v43_v42 = vld [vmem:[%s2250_s0 + $0xb8] sm:$0xff]  ;;  %v26_v55 = vld [vmem:[%s2250_s0 + $0x30] sm:$0xff] }
   0x6   :  { %2324 = vst [vmem:[#allocation5_spill] sm:$0xff] %v1634_v14  ;;  %1372 = vmatprep.subr.bf16.mxu0 %v1634_v14  ;;  %v1659_v26 = vsub.f32 %v39_v8, %v110_v11  ;;  %v1661_v27 = vpack.c.bf16 %v62_v17, %v59_v16  ;;  %v1663_v28 = vsub.f32 %v22_v12, %v59_v16  ;;  %v113_v29 = vand.u32 4294901760, %v40_v18  ;;  %v27_v56 = vld [vmem:[%s2250_s0 + $0x38] sm:$0xff] }
   0x7   :  { %1374 = vmatpush3.bf16.msra.mxu0 %v1644_v20  ;;  %v116_v30 = vand.u32 4294901760, %v41_v19  ;;  %v1666_v31 = vsub.f32 %v36_v0, %v101_v3  ;;  %v1668_v32 = vsub.f32 %v37_v1, %v104_v4  ;;  %v65_v33 = vand.u32 4294901760, %v24_v23 }
   0x8   :  { %1376 = vmatprep.subr.bf16.mxu0 %v1648_v22  ;;  %v68_v34 = vand.u32 4294901760, %v25_v24  ;;  %v2269_v35 = vand.u32 4294901760, %v1636_v15  ;;  %v2268_v36 = vand.u32 4294901760, %v1646_v21  ;;  %v1676_v38 = vsub.f32 %v23_v13, %v62_v17 }
   0x9   :  { %v1678_v39 = vpack.c.bf16 %v116_v30, %v113_v29  ;;  %v1680_v40 = vsub.f32 %v40_v18, %v113_v29  ;;  %v2274_v41 = vand.u32 4294901760, %v1666_v31  ;;  %v1686_v43 = vsub.f32 %v41_v19, %v116_v30 }
   0xa   :  { %v2271_v44 = vand.u32 4294901760, %v1668_v32  ;;  %v1689_v45 = vpack.c.bf16 %v68_v34, %v65_v33  ;;  %v1691_v46 = vsub.f32 %v24_v23, %v65_v33  ;;  %v213_v48 = vsub.f32 %v1636_v15, %v2269_v35 }
   0xb   :  { %1378 = vmatpush3.bf16.msra.mxu0 %v1661_v27  ;;  %v325_v47 = vsub.f32 %v1666_v31, %v2274_v41  ;;  %v220_v49 = vsub.f32 %v1646_v21, %v2268_v36  ;;  %v119_v50 = vand.u32 4294901760, %v42_v37  ;;  %v122_v52 = vand.u32 4294901760, %v43_v42 }
   0xc   :  { %1380 = vmatprep.subr.bf16.mxu0 %v1678_v39  ;;  %v332_v51 = vsub.f32 %v1668_v32, %v2271_v44  ;;  %v2266_v53 = vand.u32 4294901760, %v1657_v25  ;;  %v2265_v54 = vand.u32 4294901760, %v1659_v26  ;;  %v1715_v58 = vsub.f32 %v25_v24, %v68_v34 }
   0xd   :  { %v326_v57 = vand.u32 4294901760, %v325_v47  ;;  %v214_v59 = vand.u32 4294901760, %v213_v48  ;;  %v221_v60 = vand.u32 4294901760, %v220_v49  ;;  %v1717_v62 = vpack.c.bf16 %v122_v52, %v119_v50 }
   0xe   :  { %v333_v61 = vand.u32 4294901760, %v332_v51  ;;  %v1719_v63 = vsub.f32 %v42_v37, %v119_v50  ;;  %v339_v0 = vsub.f32 %v1657_v25, %v2266_v53 }
   0xf   :  { %7 = vsyncpa [#allocation3], 0  ;;  %1382 = vmatpush3.bf16.msra.mxu0 %v1689_v45  ;;  %v1405_v1 = vpack.c.bf16 %v221_v60, %v214_v59  ;;  %v346_v2 = vsub.f32 %v1659_v26, %v2265_v54  ;;  %v71_v3 = vand.u32 4294901760, %v26_v55  ;;  %v74_v4 = vand.u32 4294901760, %v27_v56  ;;  %v44_v5 = vld [vmem:[%s2250_s0 + $0xc0] sm:$0xff]  ;;  %v45_v6 = vld [vmem:[%s2250_s0 + $0xc8] sm:$0xff] }
  0x10   :  { %v1403_v7 = vpack.c.bf16 %v333_v61, %v326_v57  ;;  %1384 = vmatprep.subr.bf16.mxu0 %v1717_v62  ;;  %v340_v8 = vand.u32 4294901760, %v339_v0  ;;  %v2264_v9 = vand.u32 4294901760, %v1663_v28  ;;  %v2261_v10 = vand.u32 4294901760, %v1676_v38  ;;  %v28_v11 = vld [vmem:[%s2250_s0 + $0x40] sm:$0xff]  ;;  %v29_v29 = vld [vmem:[%s2250_s0 + $0x48] sm:$0xff]  ;;  %v47_v57 = vld [vmem:[%s2250_s0 + $0xd8] sm:$0xff] }
  0x11   :  { %v1740_v12 = vsub.f32 %v43_v42, %v122_v52  ;;  %v347_v13 = vand.u32 4294901760, %v346_v2  ;;  %v1742_v16 = vpack.c.bf16 %v74_v4, %v71_v3  ;;  %v1744_v17 = vsub.f32 %v26_v55, %v71_v3 }
  0x12   :  { %1404 = vmatprep.subr.bf16.mxu1 %v1403_v7  ;;  %v227_v18 = vsub.f32 %v1663_v28, %v2264_v9  ;;  %v234_v19 = vsub.f32 %v1676_v38, %v2261_v10  ;;  %v125_v23 = vand.u32 4294901760, %v44_v5  ;;  %v128_v24 = vand.u32 4294901760, %v45_v6 }
  0x13   :  { %1406 = vmatpush3.bf16.msra.mxu1 %v1405_v1  ;;  %v1407_v30 = vpack.c.bf16 %v347_v13, %v340_v8  ;;  %1386 = vmatpush3.bf16.msra.mxu0 %v1742_v16  ;;  %v2259_v33 = vand.u32 4294901760, %v1680_v40  ;;  %v2258_v34 = vand.u32 4294901760, %v1686_v43  ;;  %v77_v37 = vand.u32 4294901760, %v28_v11  ;;  %v30_v1 = vld [vmem:[%s2250_s0 + $0x50] sm:$0xff] }
  0x14   :  { %v1758_v42 = vsub.f32 %v27_v56, %v74_v4  ;;  %v228_v47 = vand.u32 4294901760, %v227_v18  ;;  %v235_v48 = vand.u32 4294901760, %v234_v19  ;;  %v1760_v49 = vpack.c.bf16 %v128_v24, %v125_v23  ;;  %v46_v56 = vld [vmem:[%s2250_s0 + $0xd0] sm:$0xff]  ;;  %v31_v18 = vld [vmem:[%s2250_s0 + $0x58] sm:$0xff] }
  0x15   :  { %1408 = vmatprep.subr.bf16.mxu1 %v1407_v30  ;;  %v1762_v50 = vsub.f32 %v44_v5, %v125_v23  ;;  %v353_v51 = vsub.f32 %v1680_v40, %v2259_v33  ;;  %v360_v52 = vsub.f32 %v1686_v43, %v2258_v34  ;;  %v80_v55 = vand.u32 4294901760, %v29_v29 }
  0x16   :  { %2325 = vst [vmem:[#allocation6_spill] sm:$0xff] %v1760_v49  ;;  %v1409_v59 = vpack.c.bf16 %v235_v48, %v228_v47  ;;  %1388 = vmatprep.subr.bf16.mxu0 %v1760_v49  ;;  %v1777_v60 = vsub.f32 %v45_v6, %v128_v24  ;;  %v2256_v61 = vand.u32 4294901760, %v1691_v46  ;;  %v2255_v0 = vand.u32 4294901760, %v1715_v58 }
  0x17   :  { %v354_v2 = vand.u32 4294901760, %v353_v51  ;;  %v361_v3 = vand.u32 4294901760, %v360_v52  ;;  %v1784_v4 = vpack.c.bf16 %v80_v55, %v77_v37  ;;  %v1786_v5 = vsub.f32 %v28_v11, %v77_v37 }
  0x18   :  { %1410 = vmatpush3.bf16.msra.mxu1 %v1409_v59  ;;  %v241_v6 = vsub.f32 %v1691_v46, %v2256_v61  ;;  %v248_v7 = vsub.f32 %v1715_v58, %v2255_v0  ;;  %v131_v8 = vand.u32 4294901760, %v46_v56  ;;  %v134_v13 = vand.u32 4294901760, %v47_v57 }
  0x19   :  { %2326 = vst [vmem:[#allocation7_spill] sm:$0xff] %v1784_v4  ;;  %v1411_v19 = vpack.c.bf16 %v361_v3, %v354_v2  ;;  %1390 = vmatpush3.bf16.msra.mxu0 %v1784_v4  ;;  %v2254_v11 = vand.u32 4294901760, %v1719_v63  ;;  %v2253_v23 = vand.u32 4294901760, %v1740_v12  ;;  %v83_v24 = vand.u32 4294901760, %v30_v1 }
  0x1a   :  { %v1800_v30 = vsub.f32 %v29_v29, %v80_v55  ;;  %v242_v37 = vand.u32 4294901760, %v241_v6  ;;  %v249_v47 = vand.u32 4294901760, %v248_v7  ;;  %v1802_v48 = vpack.c.bf16 %v134_v13, %v131_v8  ;;  %v48_v29 = vld [vmem:[%s2250_s0 + $0xe0] sm:$0xff]  ;;  %v49_v55 = vld [vmem:[%s2250_s0 + $0xe8] sm:$0xff] }
  0x1b   :  { %1412 = vmatprep.subr.bf16.mxu1 %v1411_v19  ;;  %v1804_v51 = vsub.f32 %v46_v56, %v131_v8  ;;  %v367_v52 = vsub.f32 %v1719_v63, %v2254_v11  ;;  %v374_v59 = vsub.f32 %v1740_v12, %v2253_v23  ;;  %v86_v2 = vand.u32 4294901760, %v31_v18  ;;  %v32_v8 = vld [vmem:[%s2250_s0 + $0x60] sm:$0xff] }
  0x1c   :  { %2327 = vst [vmem:[#allocation8_spill] sm:$0xff] %v1802_v48  ;;  %v1413_v3 = vpack.c.bf16 %v249_v47, %v242_v37  ;;  %1392 = vmatprep.subr.bf16.mxu0 %v1802_v48  ;;  %v1819_v56 = vsub.f32 %v47_v57, %v134_v13  ;;  %v2257_v6 = vand.u32 4294901760, %v1744_v17  ;;  %v2260_v7 = vand.u32 4294901760, %v1758_v42 }
  0x1d   :  { %v368_v19 = vand.u32 4294901760, %v367_v52  ;;  %v375_v23 = vand.u32 4294901760, %v374_v59  ;;  %v1826_v11 = vpack.c.bf16 %v86_v2, %v83_v24  ;;  %v1828_v0 = vsub.f32 %v30_v1, %v83_v24  ;;  %v33_v52 = vld [vmem:[%s2250_s0 + $0x68] sm:$0xff] }
  0x1e   :  { %1414 = vmatpush3.bf16.msra.mxu1 %v1413_v3  ;;  %v255_v57 = vsub.f32 %v1744_v17, %v2257_v6  ;;  %v262_v13 = vsub.f32 %v1758_v42, %v2260_v7  ;;  %v137_v37 = vand.u32 4294901760, %v48_v29  ;;  %v140_v47 = vand.u32 4294901760, %v49_v55 }
  0x1f   :  { %2328 = vst [vmem:[#allocation9_spill] sm:$0xff] %v1826_v11  ;;  %v1415_v59 = vpack.c.bf16 %v375_v23, %v368_v19  ;;  %1394 = vmatpush3.bf16.msra.mxu0 %v1826_v11  ;;  %v2263_v1 = vand.u32 4294901760, %v1762_v50  ;;  %v2262_v24 = vand.u32 4294901760, %v1777_v60  ;;  %v89_v3 = vand.u32 4294901760, %v32_v8  ;;  %v19_v11 = vld [vmem:[%s2251_s1 + $0x38] sm:$0xff] }
  0x20   :  { %v1842_v61 = vsub.f32 %v31_v18, %v86_v2  ;;  %v256_v6 = vand.u32 4294901760, %v255_v57  ;;  %v263_v34 = vand.u32 4294901760, %v262_v13  ;;  %v1844_v33 = vpack.c.bf16 %v140_v47, %v137_v37  ;;  %v50_v18 = vld [vmem:[%s2250_s0 + $0xf0] sm:$0xff]  ;;  %v51_v2 = vld [vmem:[%s2250_s0 + $0xf8] sm:$0xff] }
  0x21   :  { %1416 = vmatprep.subr.bf16.mxu1 %v1415_v59  ;;  %v1846_v7 = vsub.f32 %v48_v29, %v137_v37  ;;  %v381_v23 = vsub.f32 %v1762_v50, %v2263_v1  ;;  %v388_v19 = vsub.f32 %v1777_v60, %v2262_v24  ;;  %v92_v10 = vand.u32 4294901760, %v33_v52  ;;  %v34_v59 = vld [vmem:[%s2250_s0 + $0x70] sm:$0xff] }
  0x22   :  { %2329 = vst [vmem:[#allocation10_spill] sm:$0xff] %v1844_v33  ;;  %v1417_v57 = vpack.c.bf16 %v263_v34, %v256_v6  ;;  %1396 = vmatprep.subr.bf16.mxu0 %v1844_v33  ;;  %v1861_v29 = vsub.f32 %v49_v55, %v140_v47  ;;  %v2267_v13 = vand.u32 4294901760, %v1786_v5  ;;  %v2270_v37 = vand.u32 4294901760, %v1800_v30 }
  0x23   :  { %v382_v24 = vand.u32 4294901760, %v381_v23  ;;  %v389_v1 = vand.u32 4294901760, %v388_v19  ;;  %v1868_v9 = vpack.c.bf16 %v92_v10, %v89_v3  ;;  %v1870_v54 = vsub.f32 %v32_v8, %v89_v3  ;;  %v35_v23 = vld [vmem:[%s2250_s0 + $0x78] sm:$0xff] }
  0x24   :  { %1418 = vmatpush3.bf16.msra.mxu1 %v1417_v57  ;;  %v269_v34 = vsub.f32 %v1786_v5, %v2267_v13  ;;  %v276_v55 = vsub.f32 %v1800_v30, %v2270_v37  ;;  %v143_v6 = vand.u32 4294901760, %v50_v18  ;;  %v146_v47 = vand.u32 4294901760, %v51_v2 }
  0x25   :  { %2330 = vst [vmem:[#allocation11_spill] sm:$0xff] %v1868_v9  ;;  %v1419_v19 = vpack.c.bf16 %v389_v1, %v382_v24  ;;  %1398 = vmatpush3.bf16.msra.mxu0 %v1868_v9  ;;  %v2273_v8 = vand.u32 4294901760, %v1804_v51  ;;  %v2272_v3 = vand.u32 4294901760, %v1819_v56  ;;  %v95_v57 = vand.u32 4294901760, %v34_v59 }
  0x26   :  { %v1884_v53 = vsub.f32 %v33_v52, %v92_v10  ;;  %v270_v13 = vand.u32 4294901760, %v269_v34  ;;  %v277_v36 = vand.u32 4294901760, %v276_v55  ;;  %v1886_v35 = vpack.c.bf16 %v146_v47, %v143_v6  ;;  %v13_v10 = vld [vmem:[%s2251_s1 + $0x8] sm:$0xff] }
  0x27   :  { %1420 = vmatprep.subr.bf16.mxu1 %v1419_v19  ;;  %v1888_v37 = vsub.f32 %v50_v18, %v143_v6  ;;  %v395_v1 = vsub.f32 %v1804_v51, %v2273_v8  ;;  %v402_v24 = vsub.f32 %v1819_v56, %v2272_v3  ;;  %v98_v44 = vand.u32 4294901760, %v35_v23  ;;  %v12_v6 = vld [vmem:[%s2251_s1] sm:$0xff] }
  0x28   :  { %2331 = vst [vmem:[#allocation12_spill] sm:$0xff] %v1886_v35  ;;  %v1421_v52 = vpack.c.bf16 %v277_v36, %v270_v13  ;;  %1400 = vmatprep.subr.bf16.mxu0 %v1886_v35  ;;  %v1900_v34 = vsub.f32 %v51_v2, %v146_v47  ;;  %v2277_v18 = vand.u32 4294901760, %v1828_v0  ;;  %v2278_v55 = vand.u32 4294901760, %v1842_v61 }
  0x29   :  { %v396_v19 = vand.u32 4294901760, %v395_v1  ;;  %v403_v3 = vand.u32 4294901760, %v402_v24  ;;  %v1907_v8 = vpack.c.bf16 %v98_v44, %v95_v57  ;;  %v1909_v41 = vsub.f32 %v34_v59, %v95_v57 }
  0x2a   :  { %2332 = vst [vmem:[#allocation13_spill] sm:$0xff] %v1900_v34  ;;  %1422 = vmatpush3.bf16.msra.mxu1 %v1421_v52  ;;  %v283_v36 = vsub.f32 %v1828_v0, %v2277_v18  ;;  %v290_v2 = vsub.f32 %v1842_v61, %v2278_v55  ;;  %v1917_v13 = vand.u32 4294901760, %v13_v10  ;;  %v2281_v47 = vand.u32 4294901760, %v1846_v7 }
  0x2b   :  { %2333 = vst [vmem:[#allocation14_spill] sm:$0xff] %v1907_v8  ;;  %2334 = vst [vmem:[#allocation15_spill] sm:$0xff] %v1909_v41  ;;  %v1423_v35 = vpack.c.bf16 %v403_v3, %v396_v19  ;;  %1402 = vmatpush3.bf16.msra.mxu0 %v1907_v8  ;;  %v2287_v1 = vand.u32 4294901760, %v1861_v29  ;;  %v1435_v59 = vpack.c.bf16 %v1668_v32, %v1666_v31  ;;  %v1924_v57 = vand.u32 4294901760, %v12_v6 }
  0x2c   :  { %2335 = vst [vmem:[#allocation16_spill] sm:$0xff] %v1917_v13  ;;  %v284_v24 = vand.u32 4294901760, %v283_v36  ;;  %v291_v52 = vand.u32 4294901760, %v290_v2  ;;  %v1927_v18 = vsub.f32 %v13_v10, %v1917_v13  ;;  %v409_v55 = vsub.f32 %v1846_v7, %v2281_v47  ;;  %434 = vmatprep.mubr.f32.mxu1 %v1917_v13 }
  0x2d   :  { %2336 = vst [vmem:[#allocation17_spill] sm:$0xff] %v1924_v57  ;;  %1424 = vmatprep.subr.bf16.mxu1 %v1423_v35  ;;  %v416_v3 = vsub.f32 %v1861_v29, %v2287_v1  ;;  %1436 = vmatprep.subr.bf16.mxu0 %v1435_v59  ;;  %v1937_v19 = vsub.f32 %v12_v6, %v1924_v57  ;;  %v2286_v36 = vand.u32 4294901760, %v1870_v54  ;;  %v2288_v10 = vand.u32 4294901760, %v1884_v53 }
  0x2e   :  { %v1941_v2 = vsub.f32 %v35_v23, %v98_v44  ;;  %v1425_v8 = vpack.c.bf16 %v291_v52, %v284_v24  ;;  %v2289_v47 = vand.u32 4294901760, %v1927_v18  ;;  %v410_v9 = vand.u32 4294901760, %v409_v55 }
  0x2f   :  { %2337 = vst [vmem:[#allocation18_spill] sm:$0xff] %v1937_v19  ;;  %v417_v13 = vand.u32 4294901760, %v416_v3  ;;  %v2292_v35 = vand.u32 4294901760, %v1937_v19  ;;  %v297_v59 = vsub.f32 %v1870_v54, %v2286_v36  ;;  %v304_v6 = vsub.f32 %v1884_v53, %v2288_v10 }
  0x30   :  { %2338 = vst [vmem:[#allocation19_spill] sm:$0xff] %v1941_v2  ;;  %1426 = vmatpush3.bf16.msra.mxu1 %v1425_v8  ;;  %v151_v44 = vsub.f32 %v1927_v18, %v2289_v47  ;;  %v1437_v23 = vpack.c.bf16 %v1646_v21, %v1636_v15  ;;  %v2293_v55 = vand.u32 4294901760, %v1888_v37  ;;  %v2294_v24 = vand.u32 4294901760, %v1900_v34 }
  0x31   :  { %v1427_v52 = vpack.c.bf16 %v417_v13, %v410_v9  ;;  %v157_v3 = vsub.f32 %v1937_v19, %v2292_v35  ;;  %v298_v36 = vand.u32 4294901760, %v297_v59  ;;  %v305_v1 = vand.u32 4294901760, %v304_v6  ;;  %v15_v9 = vld [vmem:[%s2251_s1 + $0x18] sm:$0xff]  ;;  %v14_v19 = vld [vmem:[%s2251_s1 + $0x10] sm:$0xff] }
  0x32   :  { %v152_v10 = vand.u32 4294901760, %v151_v44  ;;  %v423_v8 = vsub.f32 %v1888_v37, %v2293_v55  ;;  %v430_v47 = vsub.f32 %v1900_v34, %v2294_v24  ;;  %v2298_v33 = vand.u32 4294901760, %v1909_v41 }
  0x33   :  { %1428 = vmatprep.subr.bf16.mxu1 %v1427_v52  ;;  %v158_v13 = vand.u32 4294901760, %v157_v3  ;;  %v1429_v35 = vpack.c.bf16 %v305_v1, %v298_v36  ;;  %v1439_v59 = vpack.c.bf16 %v1659_v26, %v1657_v25  ;;  %v2297_v6 = vand.u32 4294901760, %v1941_v2 }
  0x34   :  { %153 = vmatprep.mubr.f32.mxu0 %v152_v10  ;;  %v424_v44 = vand.u32 4294901760, %v423_v8  ;;  %v431_v55 = vand.u32 4294901760, %v430_v47  ;;  %v311_v24 = vsub.f32 %v1909_v41, %v2298_v33  ;;  %v1983_v36 = vand.u32 4294901760, %v15_v9  ;;  %v17_v47 = vld [vmem:[%s2251_s1 + $0x28] sm:$0xff]  ;;  %v16_v10 = vld [vmem:[%s2251_s1 + $0x20] sm:$0xff] }
  0x35   :  { %159 = vmatmul.mubr.f32.vlgmr.msra.gmra.mrb[0].mxu0 %v158_v13  ;;  %1430 = vmatpush3.bf16.msra.mxu1 %v1429_v35  ;;  %v318_v1 = vsub.f32 %v1941_v2, %v2297_v6  ;;  %v1441_v35 = vpack.c.bf16 %v1676_v38, %v1663_v28  ;;  %v1443_v13 = vpack.c.bf16 %v1686_v43, %v1680_v40  ;;  %v1998_v33 = vand.u32 4294901760, %v14_v19 }
  0x36   :  { %1438 = vmatpush3.bf16.msra.mxu0 %v1437_v23  ;;  %v1431_v52 = vpack.c.bf16 %v431_v55, %v424_v44  ;;  %v312_v3 = vand.u32 4294901760, %v311_v24  ;;  %v1996_v6 = vsub.f32 %v15_v9, %v1983_v36  ;;  %v2003_v23 = vand.u32 4294901760, %v17_v47  ;;  %v18_v24 = vld [vmem:[%s2251_s1 + $0x30] sm:$0xff]  ;;  %s1592_s1 = smov [#allocation2]  }
  0x37   :  { %1440 = vmatprep.subr.bf16.mxu0 %v1439_v59  ;;  %v319_v8 = vand.u32 4294901760, %v318_v1  ;;  %v2005_v55 = vand.u32 4294901760, %v16_v10  ;;  %v1445_v9 = vpack.c.bf16 %v1715_v58, %v1691_v46  ;;  %v2014_v1 = vsub.f32 %v14_v19, %v1998_v33  ;;  %s1096_s4 = sshll.u32 %s1592_s1, 4  ;;  %s1097_s4 = int_to_ptr.vmem [resolvable:$true] %s1096_s4 }
  0x38   :  { %2339 = vst [vmem:[#allocation20_spill] sm:$0xff] %v1996_v6  ;;  %1432 = vmatprep.subr.bf16.mxu1 %v1431_v52  ;;  %v2309_v44 = vand.u32 4294901760, %v1996_v6  ;;  %v1447_v52 = vpack.c.bf16 %v1740_v12, %v1719_v63  ;;  %v2019_v48 = vsub.f32 %v17_v47, %v2003_v23  ;;  %v2024_v2 = vand.u32 4294901760, %v19_v11  ;;  %s1567_s5 = scalar_lea.vmem %s1097_s4, 1024  ;;  %p1572_p1 = scmp.lt.s32.totalorder %s1097_s4, %s1097_s4 }
  0x39   :  { %v1433_v59 = vpack.c.bf16 %v319_v8, %v312_v3  ;;  %v2022_v4 = vsub.f32 %v16_v10, %v2005_v55  ;;  %v1449_v3 = vpack.c.bf16 %v1758_v42, %v1744_v17  ;;  %v2032_v8 = vand.u32 4294901760, %v18_v24  ;;  %p1568_p0 = scmp.ne.s32.totalorder %s1097_s4, %s1567_s5  ;;  %p1573_p2 = scmp.lt.s32.totalorder %s1567_s5, %s1567_s5 }
  0x3a   :  { %1442 = vmatpush3.bf16.msra.mxu0 %v1441_v35  ;;  %v166_v19 = vsub.f32 %v1996_v6, %v2309_v44  ;;  %v2317_v35 = vand.u32 4294901760, %v2014_v1  ;;  %v1451_v47 = vpack.c.bf16 %v1777_v60, %v1762_v50  ;;  %v2318_v10 = vand.u32 4294901760, %v2019_v48 }
  0x3b   :  { %2340 = vst [vmem:[#allocation21_spill] sm:$0xff] %v2022_v4  ;;  %1434 = vmatpush3.bf16.msra.mxu1 %v1433_v59  ;;  %1444 = vmatprep.subr.bf16.mxu0 %v1443_v13  ;;  %v2321_v13 = vand.u32 4294901760, %v2022_v4  ;;  %v2040_v59 = vsub.f32 %v19_v11, %v2024_v2  ;;  %v2046_v6 = vsub.f32 %v18_v24, %v2032_v8  ;;  %v2342_v49 = vand.u32 4294901760, %v1668_v32  ;;  %p1574_p3 = por %p1573_p2, %p1572_p1 }
  0x3c   :  { %1468 = vmatprep.subr.bf16.mxu1 %v1634_v14  ;;  %v167_v41 = vand.u32 4294901760, %v166_v19  ;;  %v172_v44 = vsub.f32 %v2014_v1, %v2317_v35  ;;  %v2341_v14 = vand.u32 4294901760, %v1666_v31  ;;  %v181_v11 = vsub.f32 %v2019_v48, %v2318_v10 }
  0x3d   :  { %v187_v19 = vsub.f32 %v2022_v4, %v2321_v13  ;;  %v2343_v35 = vand.u32 4294901760, %v1636_v15  ;;  %v2344_v31 = vand.u32 4294901760, %v1646_v21  ;;  %v2346_v10 = vand.u32 4294901760, %v1659_v26  ;;  %p1575_p4 = pnand %p1574_p3, %p1568_p0 }
  0x3e   :  { %v2052_v34 = vpack.c.bf16 %v2342_v49, %v2341_v14  ;;  %436 = vmatmul.mubr.f32.vlgmr.msra.gmra.mrb[0].mxu1 %v1924_v57  ;;  %1446 = vmatpush3.bf16.msra.mxu0 %v1445_v9  ;;  %v173_v14 = vand.u32 4294901760, %v172_v44  ;;  %v201_v49 = vand.u32 4294901760, %v2046_v6  ;;  %v2345_v9 = vand.u32 4294901760, %v1657_v25 }
  0x3f   :  { %v1501_v32 = vpack.c.bf16 %v2344_v31, %v2343_v35  ;;  %1470 = vmatpush3.bf16.msra.mxu1 %v1644_v20  ;;  %1448 = vmatprep.subr.bf16.mxu0 %v1447_v52  ;;  %v2347_v13 = vand.u32 4294901760, %v1663_v28  ;;  %v2348_v24 = vand.u32 4294901760, %v1676_v38  ;;  %v1453_v15 = vpack.c.bf16 %v1800_v30, %v1786_v5 }
  0x40   :  { %v1503_v57 = vpack.c.bf16 %v2346_v10, %v2345_v9  ;;  %1472 = vmatprep.subr.bf16.mxu1 %v1648_v22  ;;  %168 = vmatprep.mubr.f32.mxu0 %v167_v41  ;;  %v182_v21 = vand.u32 4294901760, %v181_v11  ;;  %v2349_v44 = vand.u32 4294901760, %v2040_v59  ;;  %v2350_v25 = vand.u32 4294901760, %v1680_v40 }
  0x41   :  { %v1505_v4 = vpack.c.bf16 %v2348_v24, %v2347_v13  ;;  %v2351_v26 = vand.u32 4294901760, %v1686_v43  ;;  %174 = vmatmul.mubr.f32.gmra.mrb[2].mxu0 %v173_v14  ;;  %v188_v28 = vand.u32 4294901760, %v187_v19  ;;  %441 = vmatprep.mubr.f32.mxu1 %v1983_v36  ;;  %v202_v38 = vsub.f32 %v2046_v6, %v201_v49 }
  0x42   :  { %v196_v52 = vsub.f32 %v2040_v59, %v2349_v44  ;;  %v2352_v41 = vand.u32 4294901760, %v1691_v46  ;;  %v2353_v10 = vand.u32 4294901760, %v1715_v58  ;;  %v2354_v11 = vand.u32 4294901760, %v1719_v63  ;;  %1450 = vmatpush3.bf16.msra.mxu0 %v1449_v3  ;;  %183 = vmatprep.mubr.f32.mxu0 %v182_v21 }
  0x43   :  { %v1507_v35 = vpack.c.bf16 %v2351_v26, %v2350_v25  ;;  %v2355_v40 = vand.u32 4294901760, %v1740_v12  ;;  %v2356_v19 = vand.u32 4294901760, %v1744_v17  ;;  %v2357_v31 = vand.u32 4294901760, %v1758_v42  ;;  %1474 = vmatpush3.bf16.msra.mxu1 %v1661_v27  ;;  %1452 = vmatprep.subr.bf16.mxu0 %v1451_v47  ;;  %v2368_v25 = vld [vmem:[#allocation19_spill] sm:$0xff] }
  0x44   :  { %v1509_v13 = vpack.c.bf16 %v2353_v10, %v2352_v41  ;;  %v197_v43 = vand.u32 4294901760, %v196_v52  ;;  %v2358_v9 = vand.u32 4294901760, %v1762_v50  ;;  %v2359_v46 = vand.u32 4294901760, %v1777_v60  ;;  %1476 = vmatprep.subr.bf16.mxu1 %v1678_v39  ;;  %443 = vmatmul.mubr.f32.gmra.mrb[2].mxu1 %v1998_v33  ;;  %v2367_v52 = vld [vmem:[#allocation15_spill] sm:$0xff]  ;;  %v2371_v41 = vld [vmem:[#allocation9_spill] sm:$0xff]  ;;  %v2372_v10 = vld [vmem:[#allocation10_spill] sm:$0xff] }
  0x45   :  { %v1511_v24 = vpack.c.bf16 %v2355_v40, %v2354_v11  ;;  %v1513_v14 = vpack.c.bf16 %v2357_v31, %v2356_v19  ;;  %v2360_v58 = vand.u32 4294901760, %v1786_v5  ;;  %v2361_v63 = vand.u32 4294901760, %v1800_v30  ;;  %189 = vmatmul.mubr.f32.gmra.mrb[4].mxu0 %v188_v28  ;;  %448 = vmatprep.mubr.f32.mxu1 %v2003_v23  ;;  %v2369_v28 = vld [vmem:[#allocation7_spill] sm:$0xff]  ;;  %v2373_v11 = vld [vmem:[#allocation18_spill] sm:$0xff]  ;;  %v2379_v31 = vld [vmem:[#allocation21_spill] sm:$0xff] }
  0x46   :  { %v2106_v44 = vpack.c.bf16 %v2359_v46, %v2358_v9  ;;  %v1455_v17 = vpack.c.bf16 %v1819_v56, %v1804_v51  ;;  %v2362_v42 = vand.u32 4294901760, %v1804_v51  ;;  %v2363_v50 = vand.u32 4294901760, %v1819_v56  ;;  %1454 = vmatpush3.bf16.msra.mxu0 %v1453_v15  ;;  %198 = vmatprep.mubr.f32.mxu0 %v197_v43  ;;  %v2364_v56 = vld [vmem:[#allocation13_spill] sm:$0xff]  ;;  %v2365_v15 = vld [vmem:[#allocation6_spill] sm:$0xff]  ;;  %v2375_v40 = vld [vmem:[#allocation11_spill] sm:$0xff] }
  0x47   :  { %v2112_v12 = vpack.c.bf16 %v2361_v63, %v2360_v58  ;;  %v203_v60 = vand.u32 4294901760, %v202_v38  ;;  %v1457_v5 = vpack.c.bf16 %v1842_v61, %v1828_v0  ;;  %1478 = vmatpush3.bf16.msra.mxu1 %v1689_v45  ;;  %v1459_v30 = vpack.c.bf16 %v1861_v29, %v1846_v7  ;;  %v2370_v38 = vld [vmem:[#allocation8_spill] sm:$0xff]  ;;  %v2377_v19 = vld [vmem:[#allocation14_spill] sm:$0xff] }
  0x48   :  { %v2121_v3 = vpack.c.bf16 %v2363_v50, %v2362_v42  ;;  %1456 = vmatprep.subr.bf16.mxu0 %v1455_v17  ;;  %1480 = vmatprep.subr.bf16.mxu1 %v1717_v62  ;;  %v1461_v51 = vpack.c.bf16 %v1884_v53, %v1870_v54  ;;  %v1463_v47 = vpack.c.bf16 %v2364_v56, %v1888_v37  ;;  %v2366_v21 = vand.u32 4294901760, %v1927_v18  ;;  %v2376_v43 = vld [vmem:[#allocation12_spill] sm:$0xff] }
  0x49   :  { %450 = vmatmul.mubr.f32.gmra.mrb[4].mxu1 %v2005_v55  ;;  %204 = vmatmul.mubr.f32.gmra.mrb[6].mxu0 %v203_v60  ;;  %v1465_v26 = vpack.c.bf16 %v2368_v25, %v2367_v52  ;;  %vm1082_vm0 = vcmask 523264  }
  0x4a   :  { %455 = vmatprep.mubr.f32.mxu1 %v2024_v2  ;;  %1458 = vmatpush3.bf16.msra.mxu0 %v1457_v5 }
  0x4b   :  { %592 = vmatprep.mubr.f32.mxu0 %v1927_v18  ;;  %1482 = vmatpush3.bf16.msra.mxu1 %v1742_v16  ;;  %v2374_v18 = vld [vmem:[#allocation20_spill] sm:$0xff] }
  0x4c   :  { %1460 = vmatprep.subr.bf16.mxu0 %v1459_v30  ;;  %1484 = vmatprep.subr.bf16.mxu1 %v2365_v15 }
  0x4d   :  { %457 = vmatmul.mubr.f32.gmra.mrb[6].mxu1 %v2032_v8 }
  0x4e   :  { %726 = vmatprep.mubr.f32.mxu1 %v2366_v21  ;;  %1462 = vmatpush3.bf16.msra.mxu0 %v1461_v51 }
  0x4f   :  { %1486 = vmatpush3.bf16.msra.mxu1 %v2369_v28  ;;  %1464 = vmatprep.subr.bf16.mxu0 %v1463_v47 }
  0x50   :  { %1488 = vmatprep.subr.bf16.mxu1 %v2370_v38 }
  0x52   :  { %1466 = vmatpush3.bf16.msra.mxu0 %v1465_v26 }
  0x53   :  { %1490 = vmatpush3.bf16.msra.mxu1 %v2371_v41  ;;  %1500 = vmatprep.subr.bf16.mxu0 %v2052_v34  ;;  %v2378_v34 = vld [vmem:[#allocation5_spill] sm:$0xff] }
  0x54   :  { %1492 = vmatprep.subr.bf16.mxu1 %v2372_v10 }
  0x55   :  { %595 = vmatmul.mubr.f32.vlgmr.msra.gmra.mrb[8].mxu0 %v2373_v11 }
  0x56   :  { %1502 = vmatpush3.bf16.msra.mxu0 %v1501_v32  ;;  %601 = vmatprep.mubr.f32.mxu0 %v2374_v18  ;;  %v2380_v32 = vand.u32 4294901760, %v2373_v11 }
  0x57   :  { %1494 = vmatpush3.bf16.msra.mxu1 %v2375_v40  ;;  %1504 = vmatprep.subr.bf16.mxu0 %v1503_v57  ;;  %v2381_v57 = vand.u32 4294901760, %v2374_v18 }
  0x58   :  { %1496 = vmatprep.subr.bf16.mxu1 %v2376_v43 }
  0x59   :  { %604 = vmatmul.mubr.f32.gmra.mrb[10].mxu0 %v2014_v1 }
  0x5a   :  { %1506 = vmatpush3.bf16.msra.mxu0 %v1505_v4  ;;  %610 = vmatprep.mubr.f32.mxu0 %v2019_v48  ;;  %v2382_v4 = vand.u32 4294901760, %v2014_v1  ;;  %v2387_v1 = vand.u32 4294901760, %v1842_v61  ;;  %v2391_v61 = vand.u32 4294901760, %v1870_v54  ;;  %v2396_v54 = vand.u32 4294901760, %v2368_v25 }
  0x5b   :  { %1498 = vmatpush3.bf16.msra.mxu1 %v2377_v19  ;;  %1508 = vmatprep.subr.bf16.mxu0 %v1507_v35  ;;  %v2383_v35 = vand.u32 4294901760, %v2019_v48  ;;  %v2389_v48 = vand.u32 4294901760, %v1846_v7  ;;  %v2393_v7 = vand.u32 4294901760, %v1888_v37 }
  0x5c   :  { %1532 = vmatprep.subr.bf16.mxu1 %v2378_v34 }
  0x5d   :  { %613 = vmatmul.mubr.f32.gmra.mrb[12].mxu0 %v2379_v31 }
  0x5e   :  { %730 = vmatmul.mubr.f32.vlgmr.msra.gmra.mrb[8].mxu1 %v2380_v32  ;;  %1510 = vmatpush3.bf16.msra.mxu0 %v1509_v13  ;;  %v2385_v13 = vand.u32 4294901760, %v2379_v31 }
  0x5f   :  { %1534 = vmatpush3.bf16.msra.mxu1 %v1644_v20  ;;  %619 = vmatprep.mubr.f32.mxu0 %v2040_v59  ;;  %v2384_v20 = vld [vmem:[#allocation16_spill] sm:$0xff] }
  0x60   :  { %737 = vmatprep.mubr.f32.mxu1 %v2381_v57  ;;  %1512 = vmatprep.subr.bf16.mxu0 %v1511_v24 }
  0x61   :  { %622 = vmatmul.mubr.f32.gmra.mrb[14].mxu0 %v2046_v6  ;;  %1536 = vmatprep.subr.bf16.mxu1 %v1648_v22  ;;  %v2386_v22 = vand.u32 4294901760, %v1828_v0 }
  0x62   :  { %741 = vmatmul.mubr.f32.gmra.mrb[10].mxu1 %v2382_v4  ;;  %1514 = vmatpush3.bf16.msra.mxu0 %v1513_v14 }
  0x63   :  { %1538 = vmatpush3.bf16.msra.mxu1 %v1661_v27  ;;  %748 = vmatprep.mubr.f32.mxu1 %v2383_v35  ;;  %v1521_v24 = vpack.c.bf16 %v2387_v1, %v2386_v22  ;;  %v2388_v27 = vand.u32 4294901760, %v2040_v59 }
  0x64   :  { %1516 = vmatprep.subr.bf16.mxu0 %v2106_v44  ;;  %1540 = vmatprep.subr.bf16.mxu1 %v1678_v39  ;;  %v2390_v39 = vand.u32 4294901760, %v1861_v29  ;;  %v2394_v29 = vand.u32 4294901760, %v2364_v56 }
  0x65   :  { %929 = vmatprep.mubr.f32.mxu0 %v2384_v20 }
  0x66   :  { %752 = vmatmul.mubr.f32.gmra.mrb[12].mxu1 %v2385_v13  ;;  %1518 = vmatpush3.bf16.msra.mxu0 %v2112_v12  ;;  %v1523_v14 = vpack.c.bf16 %v2390_v39, %v2389_v48  ;;  %v1527_v59 = vpack.c.bf16 %v2394_v29, %v2393_v7 }
  0x67   :  { %1542 = vmatpush3.bf16.msra.mxu1 %v1689_v45  ;;  %759 = vmatprep.mubr.f32.mxu1 %v2388_v27  ;;  %v2392_v45 = vand.u32 4294901760, %v1884_v53  ;;  %v2397_v53 = vld [vmem:[#allocation17_spill] sm:$0xff] }
  0x68   :  { %1520 = vmatprep.subr.bf16.mxu0 %v2121_v3  ;;  %1544 = vmatprep.subr.bf16.mxu1 %v1717_v62  ;;  %v2395_v62 = vand.u32 4294901760, %v2367_v52 }
  0x69   :  { %v1525_v0 = vpack.c.bf16 %v2392_v45, %v2391_v61 }
  0x6a   :  { %763 = vmatmul.mubr.f32.gmra.mrb[14].mxu1 %v201_v49  ;;  %1522 = vmatpush3.bf16.msra.mxu0 %v1521_v24  ;;  %v1529_v6 = vpack.c.bf16 %v2396_v54, %v2395_v62 }
  0x6b   :  { %1546 = vmatpush3.bf16.msra.mxu1 %v1742_v16  ;;  %1524 = vmatprep.subr.bf16.mxu0 %v1523_v14  ;;  %v1591_v16 = vmov 0.0  }
  0x6c   :  { %1548 = vmatprep.subr.bf16.mxu1 %v2365_v15  ;;  %1054 = vmatprep.mubr.f32.mxu1 %v2384_v20  ;;  %1083 = vst.msk [vmem:[#allocation2] sm:$0xff] %vm1082_vm0, %v1591_v16  ;;  %1084 = vst.msk [vmem:[#allocation2 + $0x20] sm:$0xff] %vm1082_vm0, %v1591_v16 }
  0x6d   :  { %1085 = vst.msk [vmem:[#allocation2 + $0x18] sm:$0xff] %vm1082_vm0, %v1591_v16  ;;  %1086 = vst.msk [vmem:[#allocation2 + $0x38] sm:$0xff] %vm1082_vm0, %v1591_v16 }
  0x6e   :  { %1526 = vmatpush3.bf16.msra.mxu0 %v1525_v0 }
  0x6f   :  { %1550 = vmatpush3.bf16.msra.mxu1 %v2369_v28  ;;  %1528 = vmatprep.subr.bf16.mxu0 %v1527_v59 }
  0x70   :  { %1552 = vmatprep.subr.bf16.mxu1 %v2370_v38 }
  0x72   :  { %1530 = vmatpush3.bf16.msra.mxu0 %v1529_v6 }
  0x73   :  { %1554 = vmatpush3.bf16.msra.mxu1 %v2371_v41 }
  0x74   :  { %1556 = vmatprep.subr.bf16.mxu1 %v2372_v10 }
  0x75   :  { %931 = vmatmul.mubr.f32.vlgmr.msra.gmra.mrb[16].mxu0 %v2397_v53 }
  0x76   :  { %936 = vmatprep.mubr.f32.mxu0 %v1983_v36 }
  0x77   :  { %1558 = vmatpush3.bf16.msra.mxu1 %v2375_v40 }
  0x78   :  { %1560 = vmatprep.subr.bf16.mxu1 %v2376_v43 }
  0x79   :  { %938 = vmatmul.mubr.f32.gmra.mrb[18].mxu0 %v1998_v33 }
  0x7a   :  { %943 = vmatprep.mubr.f32.mxu0 %v2003_v23 }
  0x7b   :  { %1562 = vmatpush3.bf16.msra.mxu1 %v2377_v19 }
  0x7d   :  { %945 = vmatmul.mubr.f32.gmra.mrb[20].mxu0 %v2005_v55 }
  0x7e   :  { %1056 = vmatmul.mubr.f32.vlgmr.msra.gmra.mrb[16].mxu1 %v2397_v53  ;;  %950 = vmatprep.mubr.f32.mxu0 %v2024_v2 }
  0x7f   :  { %1061 = vmatprep.mubr.f32.mxu1 %v1983_v36 }
  0x81   :  { %952 = vmatmul.mubr.f32.gmra.mrb[22].mxu0 %v2032_v8 }
  0x82   :  { %1063 = vmatmul.mubr.f32.gmra.mrb[18].mxu1 %v1998_v33 }
  0x83   :  { %1068 = vmatprep.mubr.f32.mxu1 %v2003_v23 }
  0x86   :  { %1070 = vmatmul.mubr.f32.gmra.mrb[20].mxu1 %v2005_v55 }
  0x87   :  { %1075 = vmatprep.mubr.f32.mxu1 %v2024_v2 }
  0x8a   :  { %1077 = vmatmul.mubr.f32.gmra.mrb[22].mxu1 %v2032_v8 }
 0x108   :  { %v1139_v37 = vpop.f32.mrb[0].mxu0 }
 0x109   :  { %v1140_v33 = vpop.f32.mrb[1].mxu0 }
 0x10a   :  { %v1141_v36 = vadd.f32 %v1140_v33, %v1139_v37 }
 0x111   :  { %v1183_v23 = vpop.f32.mrb[0].mxu1 }
 0x112   :  { %v1184_v49 = vpop.f32.mrb[1].mxu1 }
 0x113   :  { %v1185_v55 = vadd.f32 %v1184_v49, %v1183_v23 }
 0x114   :  { %v1142_v9 = vpop.f32.mrb[2].mxu0 }
 0x115   :  { %v438_v2 = vadd.f32 %v1185_v55, %v1141_v36  ;;  %v1143_v46 = vpop.f32.mrb[3].mxu0 }
 0x116   :  { %v1144_v8 = vadd.f32 %v1143_v46, %v1142_v9 }
 0x117   :  { %v1186_v44 = vpop.f32.mrb[2].mxu1 }
 0x118   :  { %v1187_v58 = vpop.f32.mrb[3].mxu1  ;;  %v1145_v63 = vpop.f32.mrb[4].mxu0 }
 0x119   :  { %v1188_v12 = vadd.f32 %v1187_v58, %v1186_v44  ;;  %v1146_v17 = vpop.f32.mrb[5].mxu0 }
 0x11a   :  { %v1147_v42 = vadd.f32 %v1146_v17, %v1145_v63 }
 0x11b   :  { %v445_v50 = vadd.f32 %v1188_v12, %v1144_v8 }
 0x11c   :  { %v1189_v3 = vpop.f32.mrb[4].mxu1  ;;  %v1148_v60 = vpop.f32.mrb[6].mxu0 }
 0x11d   :  { %v1190_v5 = vpop.f32.mrb[5].mxu1  ;;  %v1149_v30 = vpop.f32.mrb[7].mxu0 }
 0x11e   :  { %v1191_v51 = vadd.f32 %v1190_v5, %v1189_v3  ;;  %v1150_v56 = vadd.f32 %v1149_v30, %v1148_v60 }
 0x120   :  { %v452_v47 = vadd.f32 %v1191_v51, %v1147_v42  ;;  %v1192_v15 = vpop.f32.mrb[6].mxu1 }
 0x121   :  { %v1193_v21 = vpop.f32.mrb[7].mxu1 }
 0x122   :  { %v1194_v52 = vadd.f32 %v1193_v21, %v1192_v15 }
 0x124   :  { %v459_v25 = vadd.f32 %v1194_v52, %v1150_v56 }
 0x128   :  { %v1227_v26 = vpop.f32.mrb[8].mxu0 }
 0x129   :  { %v1228_v28 = vpop.f32.mrb[9].mxu0 }
 0x12a   :  { %v1229_v38 = vadd.f32 %v1228_v28, %v1227_v26 }
 0x12c   :  { %v597_v41 = vadd.f32 %v1229_v38, %v438_v2  ;;  %v1230_v10 = vpop.f32.mrb[10].mxu0 }
 0x12d   :  { %v1231_v11 = vpop.f32.mrb[11].mxu0 }
 0x12e   :  { %v1232_v18 = vadd.f32 %v1231_v11, %v1230_v10 }
 0x130   :  { %v606_v40 = vadd.f32 %v1232_v18, %v445_v50  ;;  %v1233_v43 = vpop.f32.mrb[12].mxu0 }
 0x131   :  { %v1271_v19 = vpop.f32.mrb[8].mxu1  ;;  %v1234_v34 = vpop.f32.mrb[13].mxu0 }
 0x132   :  { %v1235_v31 = vadd.f32 %v1234_v34, %v1233_v43  ;;  %v1272_v32 = vpop.f32.mrb[9].mxu1 }
 0x133   :  { %v1273_v57 = vadd.f32 %v1272_v32, %v1271_v19 }
 0x134   :  { %v615_v4 = vadd.f32 %v1235_v31, %v452_v47  ;;  %v1236_v35 = vpop.f32.mrb[14].mxu0 }
 0x135   :  { %v732_v20 = vadd.f32 %v1273_v57, %v597_v41  ;;  %v1274_v13 = vpop.f32.mrb[10].mxu1  ;;  %v1237_v22 = vpop.f32.mrb[15].mxu0 }
 0x136   :  { %v1238_v1 = vadd.f32 %v1237_v22, %v1236_v35  ;;  %v1275_v24 = vpop.f32.mrb[11].mxu1 }
 0x137   :  { %v1276_v27 = vadd.f32 %v1275_v24, %v1274_v13 }
 0x138   :  { %v624_v48 = vadd.f32 %v1238_v1, %v459_v25 }
 0x139   :  { %v743_v39 = vadd.f32 %v1276_v27, %v606_v40  ;;  %v1277_v14 = vpop.f32.mrb[12].mxu1 }
 0x13a   :  { %v1278_v61 = vpop.f32.mrb[13].mxu1 }
 0x13b   :  { %v1279_v45 = vadd.f32 %v1278_v61, %v1277_v14 }
 0x13d   :  { %v754_v0 = vadd.f32 %v1279_v45, %v615_v4  ;;  %v1280_v7 = vpop.f32.mrb[14].mxu1 }
 0x13e   :  { %v1281_v29 = vpop.f32.mrb[15].mxu1 }
 0x13f   :  { %v1282_v59 = vadd.f32 %v1281_v29, %v1280_v7 }
 0x141   :  { %v765_v62 = vadd.f32 %v1282_v59, %v624_v48 }
 0x148   :  { %v1315_v54 = vpop.f32.mrb[16].mxu0 }
 0x149   :  { %v1316_v6 = vpop.f32.mrb[17].mxu0 }
 0x14a   :  { %v1317_v53 = vadd.f32 %v1316_v6, %v1315_v54 }
 0x14c   :  { %v933_v16 = vadd.f32 %v1317_v53, %v732_v20  ;;  %v1318_v37 = vpop.f32.mrb[18].mxu0 }
 0x14d   :  { %v1319_v33 = vpop.f32.mrb[19].mxu0 }
 0x14e   :  { %v1320_v36 = vadd.f32 %v1319_v33, %v1318_v37 }
 0x150   :  { %v940_v23 = vadd.f32 %v1320_v36, %v743_v39  ;;  %v1321_v49 = vpop.f32.mrb[20].mxu0 }
 0x151   :  { %v1359_v55 = vpop.f32.mrb[16].mxu1  ;;  %v1322_v9 = vpop.f32.mrb[21].mxu0 }
 0x152   :  { %v1323_v2 = vadd.f32 %v1322_v9, %v1321_v49  ;;  %v1360_v46 = vpop.f32.mrb[17].mxu1 }
 0x153   :  { %v1361_v8 = vadd.f32 %v1360_v46, %v1359_v55 }
 0x154   :  { %v947_v44 = vadd.f32 %v1323_v2, %v754_v0  ;;  %v1324_v58 = vpop.f32.mrb[22].mxu0 }
 0x155   :  { %v1058_v63 = vadd.f32 %v1361_v8, %v933_v16  ;;  %v1362_v12 = vpop.f32.mrb[18].mxu1  ;;  %v1325_v17 = vpop.f32.mrb[23].mxu0 }
 0x156   :  { %v1326_v42 = vadd.f32 %v1325_v17, %v1324_v58  ;;  %v1363_v50 = vpop.f32.mrb[19].mxu1 }
 0x157   :  { %1087 = vst.msk [vmem:[#allocation2 + $0x8] sm:$0xff] %vm1082_vm0, %v1058_v63  ;;  %v1364_v3 = vadd.f32 %v1363_v50, %v1362_v12 }
 0x158   :  { %v954_v60 = vadd.f32 %v1326_v42, %v765_v62 }
 0x159   :  { %v1065_v5 = vadd.f32 %v1364_v3, %v940_v23  ;;  %v1365_v30 = vpop.f32.mrb[20].mxu1 }
 0x15a   :  { %v1366_v51 = vpop.f32.mrb[21].mxu1 }
 0x15b   :  { %1088 = vst.msk [vmem:[#allocation2 + $0x10] sm:$0xff] %vm1082_vm0, %v1065_v5  ;;  %v1367_v56 = vadd.f32 %v1366_v51, %v1365_v30 }
 0x15d   :  { %v1072_v47 = vadd.f32 %v1367_v56, %v947_v44  ;;  %v1368_v15 = vpop.f32.mrb[22].mxu1 }
 0x15e   :  { %v1369_v21 = vpop.f32.mrb[23].mxu1 }
 0x15f   :  { %1089 = vst.msk [vmem:[#allocation2 + $0x28] sm:$0xff] %vm1082_vm0, %v1072_v47  ;;  %v1370_v52 = vadd.f32 %v1369_v21, %v1368_v15 }
 0x161   :  { %v1079_v25 = vadd.f32 %v1370_v52, %v954_v60 }
 0x163   :  { %1090 = vst.msk [vmem:[#allocation2 + $0x30] sm:$0xff] %vm1082_vm0, %v1079_v25 }
 0x164   :  { %1578 = shalt.err (!%p1575_p4)
}
 0x165   :  { %s1579_s8 = scalar_lea.hbm %s2252_s2, 1024 }
 0x166   :  { %p1580_p5 = scmp.ne.s32.totalorder %s2252_s2, %s1579_s8  ;;  %p1583_p6 = scmp.lt.u32.totalorder %s1579_s8, %s2252_s2 }
 0x168   :  { %p1585_p7 = pnand %p1583_p6, %p1580_p5 }
 0x16a   :  { %1588 = shalt.err (!%p1585_p7)
}
 0x16b   :  { %s1593_s13 = smov 128   ;;  %s1594_s14 = smov 8  }
 0x16c   :  { %1102 = dma.vmem_to_hbm [thread:$0]  %s1097_s4, 1024, %s2252_s2, [#allocation3], %s1593_s13, %s1593_s13, %s1594_s14  }
 0x16d   :  { %1589 = dma.done.wait [#allocation3], 1024  }
 0x16e   :  { %1590 = vsyncadd [#allocation3], 4294966272 }
 0x16f   :  { %1106 = vsyncpa [#allocation3], 1 }

</bundles_post_ra>
